<compile_context>
chip_gen: v5e
topology: v5e:2x2
jax: 0.10.0
libtpu: 0.0.40
codegen_flags: <defaults>
</compile_context>

<pallas_src>
import functools
import math

import jax
import jax.numpy as jnp
from jax import lax
from jax.experimental import pallas as pl
from jax.experimental.pallas import tpu as pltpu

NEG_INF = -1e30          # finite: NEG_INF - NEG_INF == 0 (never NaN); exp -> 0
LANE = 128
SUBLANE = 8
_VMEM_LIMIT = 48 * 1024 * 1024   # explicit budget; inside v7x's 64 MiB physical


def _round_up(v, m):
    return ((v + m - 1) // m) * m


def _leaky_relu(x):
    # max-form (mul + max) instead of cmp + select + mul.
    return jnp.maximum(x, 0.2 * x)


def _elu(x):
    return jnp.where(x > 0, x, jnp.exp(jnp.minimum(x, 0.0)) - 1.0)


def _elementwise_dtype():
    """bf16 elementwise only where the VPU/EUP have a bf16 path (v6e/v7x)."""
    try:
        kind = jax.devices()[0].device_kind.lower()
    except Exception:
        return jnp.float32
    if ("v6" in kind) or ("v7" in kind) or ("7x" in kind):
        return jnp.bfloat16
    return jnp.float32


# --------------------------------------------------------------------------
# Kernel A: layer-1 projection. w1 is extended with the per-head dst-score
# columns, so h1_ext = [h1 | s_dst(all heads)]; src scores come out as a
# lane-dense [Hs, TN] slab via one block-structured contraction.
# --------------------------------------------------------------------------
def _proj1_kernel(x_ref, w1e_ref, a1srcT_ref, h1e_ref, s1srcT_ref):
    h = jnp.dot(x_ref[...], w1e_ref[...], preferred_element_type=jnp.float32)
    hb = h.astype(jnp.bfloat16)
    h1e_ref[...] = hb                                            # [TN, K1ep]
    # 'hk,nk->hn': every head's source score in one contraction, no transpose.
    s1srcT_ref[...] = lax.dot_general(
        a1srcT_ref[...], hb, (((1,), (1,)), ((), ())),
        preferred_element_type=jnp.float32)                      # [Hs, TN]


# --------------------------------------------------------------------------
# Kernel B: layer-1 attention (online softmax over source chunks) + bias +
# ELU, fused with the layer-2 projection.  Grid = (dst tiles, src chunks).
# --------------------------------------------------------------------------
def _attn1_proj2_kernel(heads, hidden, k1, cdt,
                        adj_ref, h1s_ref, h1d_ref, s1srcT_ref,
                        b1_ref, w2e_ref, a2srcT_ref,
                        h2e_ref, s2srcT_ref,
                        m_sc, rs_sc, acc_sc):
    k = pl.program_id(1)

    @pl.when(k == 0)
    def _():
        m_sc[...] = jnp.full(m_sc.shape, NEG_INF, m_sc.dtype)
        rs_sc[...] = jnp.zeros(rs_sc.shape, rs_sc.dtype)
        acc_sc[...] = jnp.zeros(acc_sc.shape, acc_sc.dtype)

    adj = adj_ref[...] > 0                        # [TN, TS] bool predicate
    h1s = h1s_ref[...]                            # [TS, K1ep] bf16 src chunk
    neg = jnp.asarray(NEG_INF, cdt)
    C = hidden

    for hd in range(heads):                       # static unroll over heads
        sdst = h1d_ref[:, k1 + hd:k1 + hd + 1].astype(cdt)       # [TN, 1]
        ssrc = s1srcT_ref[hd:hd + 1, :].astype(cdt)              # [1, TS]
        masked = jnp.where(adj, _leaky_relu(sdst + ssrc), neg)   # [TN, TS]
        # ---- online softmax (running stats per head, fp32) ----
        m_old = m_sc[hd]                                         # [TN, 1]
        m_new = jnp.maximum(
            m_old, jnp.max(masked, axis=-1, keepdims=True).astype(jnp.float32))
        alpha = jnp.exp(m_old - m_new)
        p = jnp.where(adj, jnp.exp(masked - m_new.astype(cdt)), 0.0)
        rs_sc[hd] = alpha * rs_sc[hd] + jnp.sum(
            p.astype(jnp.float32), axis=-1, keepdims=True)
        acc_sc[hd] = alpha * acc_sc[hd] + jnp.dot(
            p.astype(jnp.bfloat16), h1s[:, hd * C:(hd + 1) * C],
            preferred_element_type=jnp.float32)                  # [TN, C]
        m_sc[hd] = m_new

    @pl.when(k == pl.num_programs(1) - 1)
    def _():
        # Normalize AFTER aggregation (EUP reciprocal), add bias, ELU, and
        # accumulate the layer-2 projection per head (x1 never reaches HBM).
        tn, dp = h2e_ref.shape
        h2 = jnp.zeros((tn, dp), jnp.float32)
        for hd in range(heads):
            rs = rs_sc[hd]
            inv = pl.reciprocal(jnp.where(rs > 0, rs, 1.0), approx=True)
            x1_h = _elu(acc_sc[hd] * inv + b1_ref[hd:hd + 1, :])    # [TN, C]
            # TODO(synk): F.dropout / attention dropout are identity (eval).
            h2 = h2 + jnp.dot(x1_h.astype(jnp.bfloat16), w2e_ref[hd],
                              preferred_element_type=jnp.float32)   # [TN, Dp]
        h2b = h2.astype(jnp.bfloat16)
        h2e_ref[...] = h2b                    # [h2 | folded s2_dst | zeros]
        s2srcT_ref[...] = lax.dot_general(    # layer-2 src scores, lane-dense
            a2srcT_ref[...], h2b, (((1,), (1,)), ((), ())),
            preferred_element_type=jnp.float32)


# --------------------------------------------------------------------------
# Kernel C: layer-2 attention (single head, online softmax over src chunks).
# --------------------------------------------------------------------------
def _attn2_kernel(hidden, cdt,
                  adj_ref, h2s_ref, h2d_ref, s2srcT_ref, b2_ref,
                  xo_ref, m_sc, rs_sc, acc_sc):
    k = pl.program_id(1)

    @pl.when(k == 0)
    def _():
        m_sc[...] = jnp.full(m_sc.shape, NEG_INF, m_sc.dtype)
        rs_sc[...] = jnp.zeros(rs_sc.shape, rs_sc.dtype)
        acc_sc[...] = jnp.zeros(acc_sc.shape, acc_sc.dtype)

    adj = adj_ref[...] > 0
    neg = jnp.asarray(NEG_INF, cdt)
    sdst = h2d_ref[:, hidden:hidden + 1].astype(cdt)             # folded s2_dst
    ssrc = s2srcT_ref[0:1, :].astype(cdt)                        # [1, TS]
    masked = jnp.where(adj, _leaky_relu(sdst + ssrc), neg)       # [TN, TS]
    m_old = m_sc[...]
    m_new = jnp.maximum(
        m_old, jnp.max(masked, axis=-1, keepdims=True).astype(jnp.float32))
    alpha = jnp.exp(m_old - m_new)
    p = jnp.where(adj, jnp.exp(masked - m_new.astype(cdt)), 0.0)
    rs_sc[...] = alpha * rs_sc[...] + jnp.sum(
        p.astype(jnp.float32), axis=-1, keepdims=True)
    acc_sc[...] = alpha * acc_sc[...] + jnp.dot(
        p.astype(jnp.bfloat16), h2s_ref[...],
        preferred_element_type=jnp.float32)                      # [TN, Dp]
    m_sc[...] = m_new

    @pl.when(k == pl.num_programs(1) - 1)
    def _():
        rs = rs_sc[...]
        inv = pl.reciprocal(jnp.where(rs > 0, rs, 1.0), approx=True)
        xo_ref[...] = acc_sc[...] * inv + b2_ref[...]


# --------------------------------------------------------------------------
# Kernel D: edge MLP  Linear -> ReLU -> (Dropout=id) -> Linear  (edge tiles).
# --------------------------------------------------------------------------
def _edge_mlp_kernel(ea_ref, w1_ref, b1_ref, w2_ref, b2_ref, eo_ref):
    h = jnp.dot(ea_ref[...], w1_ref[...], preferred_element_type=jnp.float32)
    h = jnp.maximum(h + b1_ref[...], 0.0)
    # TODO(synk): nn.Dropout(0.3) is identity (eval mode).
    eo_ref[...] = (jnp.dot(h.astype(jnp.bfloat16), w2_ref[...],
                           preferred_element_type=jnp.float32) + b2_ref[...])


# --------------------------------------------------------------------------
# Wrapper: tiling, padding / packing, and the four pallas_calls.
# --------------------------------------------------------------------------
def _node_tiling(n, tn_target=256, ts_target=512):
    """dst tile TN, src chunk TS, padded node extent Np (TN | Np, TS | Np)."""
    n8 = _round_up(max(n, 1), SUBLANE)
    if n8 <= tn_target:
        return n8, n8, n8                        # one tile, one chunk
    tn = tn_target
    step = (tn * ts_target) // math.gcd(tn, ts_target)
    np_ = _round_up(n8, step)
    ts = np_ if np_ <= ts_target else ts_target
    return tn, ts, np_


def _edge_tiling(e, te_target=512):
    e8 = _round_up(max(e, 1), SUBLANE)
    if e8 <= te_target:
        return e8, e8
    return te_target, _round_up(e8, te_target)


def gat_encoder(x, adj, edge_attr, params, *, heads, hidden,
                tn_target=256, ts_target=512,
                compute_dtype=None, single_buffer_invariants=True):
    """adj: dense [N, N] adjacency (int8 / bool / float); adj[i, j] != 0 iff
    edge j -> i (self-loops included).  Returns (node_out, edge_out)."""
    f32, bf16 = jnp.float32, jnp.bfloat16
    cdt = compute_dtype if compute_dtype is not None else _elementwise_dtype()

    N, F = x.shape
    E, A = edge_attr.shape
    C = hidden
    K1 = heads * C                        # layer-1 concat width
    Hs = _round_up(heads, SUBLANE)        # score-slab sublane extent
    M = params["we1"].shape[1]            # edge-MLP hidden width

    K1ep = _round_up(K1 + heads, LANE)    # h1 cols + folded dst-score cols
    Dp = _round_up(hidden + 1, LANE)      # h2 cols + folded s2_dst col
    TN, TS, Np = _node_tiling(N, tn_target, ts_target)
    TE, Ep = _edge_tiling(E)
    GN, GS, GE = Np // TN, Np // TS, Ep // TE

    # ---- inputs: row-pad only; tiny feature dims stay unpadded ----
    xb = x.astype(bf16)
    xp = xb if Np == N else jnp.zeros((Np, F), bf16).at[:N].set(xb)
    adj_i8 = adj if adj.dtype == jnp.int8 else (adj != 0).astype(jnp.int8)
    adj_p = adj_i8 if Np == N else \
        jnp.zeros((Np, Np), jnp.int8).at[:N, :N].set(adj_i8)
    # TODO(synk): a 1-bit packed adjacency would cut HBM/VMEM another 8x.
    eab = edge_attr.astype(bf16)
    eap = eab if Ep == E else jnp.zeros((Ep, A), bf16).at[:E].set(eab)

    # ---- layer-1 params: fold dst scores into w1; src scores as [Hs, K1ep] ----
    w1e = jnp.zeros((F, K1ep), f32).at[:, :K1].set(params["w1"])
    a1srcT = jnp.zeros((Hs, K1ep), f32)
    for hd in range(heads):
        blk = params["w1"][:, hd * C:(hd + 1) * C]
        w1e = w1e.at[:, K1 + hd].set(blk @ params["adst1"][hd])
        a1srcT = a1srcT.at[hd, hd * C:(hd + 1) * C].set(params["asrc1"][hd])
    w1e, a1srcT = w1e.astype(bf16), a1srcT.astype(bf16)
    b1_hc = params["b1"].reshape(heads, C).astype(f32)

    # ---- layer-2 params: fold s2_dst into w2; s2_src via [Hs, Dp] matrix ----
    w2e = jnp.zeros((heads, C, Dp), f32)
    for hd in range(heads):
        w2h = params["w2"][hd * C:(hd + 1) * C, :]
        w2e = w2e.at[hd, :, :hidden].set(w2h)
        w2e = w2e.at[hd, :, hidden].set(w2h @ params["adst2"][0])
    w2e = w2e.astype(bf16)
    a2srcT = jnp.zeros((Hs, Dp), f32).at[0, :hidden].set(
        params["asrc2"][0]).astype(bf16)
    b2p = jnp.zeros((1, Dp), f32).at[:, :hidden].set(params["b2"])

    # ---- edge-MLP params (only the output width is lane-padded) ----
    we1b = params["we1"].astype(bf16)
    be1 = params["be1"].astype(f32)
    we2p = jnp.zeros((M, Dp), bf16).at[:, :hidden].set(params["we2"].astype(bf16))
    be2p = jnp.zeros((1, Dp), f32).at[:, :hidden].set(params["be2"])

    # ---- spec helpers / compiler params ----
    if single_buffer_invariants:
        def inv_spec(shape, imap):       # grid-invariant -> single buffered
            return pl.BlockSpec(shape, imap, pipeline_mode=pl.Buffered(1))
    else:
        def inv_spec(shape, imap):
            return pl.BlockSpec(shape, imap)

    par1 = pltpu.CompilerParams(dimension_semantics=("parallel",),
                                vmem_limit_bytes=_VMEM_LIMIT)
    par2 = pltpu.CompilerParams(dimension_semantics=("parallel", "arbitrary"),
                                vmem_limit_bytes=_VMEM_LIMIT)

    # ---- kernel A: layer-1 projection + scores (node tiles) ----
    h1e, s1srcT = pl.pallas_call(
        _proj1_kernel,
        grid=(GN,),
        in_specs=[
            pl.BlockSpec((TN, F), lambda i: (i, 0)),
            inv_spec((F, K1ep), lambda i: (0, 0)),
            inv_spec((Hs, K1ep), lambda i: (0, 0)),
        ],
        out_specs=(
            pl.BlockSpec((TN, K1ep), lambda i: (i, 0)),
            pl.BlockSpec((Hs, TN), lambda i: (0, i)),
        ),
        out_shape=(
            jax.ShapeDtypeStruct((Np, K1ep), bf16),
            jax.ShapeDtypeStruct((Hs, Np), f32),
        ),
        compiler_params=par1,
    )(xp, w1e, a1srcT)

    # ---- kernel B: layer-1 attention + ELU + layer-2 projection ----
    h2e, s2srcT = pl.pallas_call(
        functools.partial(_attn1_proj2_kernel, heads, hidden, K1, cdt),
        grid=(GN, GS),
        in_specs=[
            pl.BlockSpec((TN, TS), lambda i, k: (i, k)),       # adj (int8)
            pl.BlockSpec((TS, K1ep), lambda i, k: (k, 0)),     # h1 src chunk
            pl.BlockSpec((TN, K1ep), lambda i, k: (i, 0)),     # h1 dst rows
            pl.BlockSpec((Hs, TS), lambda i, k: (0, k)),       # src scores
            inv_spec((heads, C), lambda i, k: (0, 0)),
            inv_spec((heads, C, Dp), lambda i, k: (0, 0, 0)),
            inv_spec((Hs, Dp), lambda i, k: (0, 0)),
        ],
        out_specs=(
            pl.BlockSpec((TN, Dp), lambda i, k: (i, 0)),
            pl.BlockSpec((Hs, TN), lambda i, k: (0, i)),
        ),
        out_shape=(
            jax.ShapeDtypeStruct((Np, Dp), bf16),
            jax.ShapeDtypeStruct((Hs, Np), f32),
        ),
        scratch_shapes=[
            pltpu.VMEM((heads, TN, 1), f32),      # running max
            pltpu.VMEM((heads, TN, 1), f32),      # running sum
            pltpu.VMEM((heads, TN, C), f32),      # running aggregate
        ],
        compiler_params=par2,
    )(adj_p, h1e, h1e, s1srcT, b1_hc, w2e, a2srcT)

    # ---- kernel C: layer-2 attention ----
    x2p = pl.pallas_call(
        functools.partial(_attn2_kernel, hidden, cdt),
        grid=(GN, GS),
        in_specs=[
            pl.BlockSpec((TN, TS), lambda i, k: (i, k)),
            pl.BlockSpec((TS, Dp), lambda i, k: (k, 0)),       # h2 src chunk
            pl.BlockSpec((TN, Dp), lambda i, k: (i, 0)),       # h2 dst rows
            pl.BlockSpec((Hs, TS), lambda i, k: (0, k)),       # src scores
            inv_spec((1, Dp), lambda i, k: (0, 0)),
        ],
        out_specs=pl.BlockSpec((TN, Dp), lambda i, k: (i, 0)),
        out_shape=jax.ShapeDtypeStruct((Np, Dp), f32),
        scratch_shapes=[
            pltpu.VMEM((TN, 1), f32),
            pltpu.VMEM((TN, 1), f32),
            pltpu.VMEM((TN, Dp), f32),
        ],
        compiler_params=par2,
    )(adj_p, h2e, h2e, s2srcT, b2p)

    # ---- kernel D: edge MLP (independent of the GAT path) ----
    eop = pl.pallas_call(
        _edge_mlp_kernel,
        grid=(GE,),
        in_specs=[
            pl.BlockSpec((TE, A), lambda i: (i, 0)),
            inv_spec((A, M), lambda i: (0, 0)),
            inv_spec((1, M), lambda i: (0, 0)),
            inv_spec((M, Dp), lambda i: (0, 0)),
            inv_spec((1, Dp), lambda i: (0, 0)),
        ],
        out_specs=pl.BlockSpec((TE, Dp), lambda i: (i, 0)),
        out_shape=jax.ShapeDtypeStruct((Ep, Dp), f32),
        compiler_params=par1,
    )(eap, we1b, be1, we2p, be2p)

    return x2p[:N, :hidden], eop[:E, :hidden]


# --------------------------------------------------------------------------
# Pure-JAX fp32 reference (mirrors PyG GATConv semantics with dense adj).
# --------------------------------------------------------------------------
def _reference(x, adj, edge_attr, params, *, heads, hidden):
    adj_b = adj != 0

    def attend(h, a_src, a_dst):
        s_src = h @ a_src
        s_dst = h @ a_dst
        pre = s_dst[:, None] + s_src[None, :]
        logit = jnp.where(adj_b, _leaky_relu(pre), -jnp.inf)
        att = jax.nn.softmax(logit, axis=-1)
        att = jnp.where(adj_b, att, 0.0)
        return att @ h

    h1 = x @ params["w1"]
    outs = [attend(h1[:, hd * hidden:(hd + 1) * hidden],
                   params["asrc1"][hd], params["adst1"][hd])
            for hd in range(heads)]
    x1 = jax.nn.elu(jnp.concatenate(outs, axis=-1) + params["b1"])
    h2 = x1 @ params["w2"]
    x2 = attend(h2, params["asrc2"][0], params["adst2"][0]) + params["b2"]
    e1 = jax.nn.relu(edge_attr @ params["we1"] + params["be1"])
    e2 = e1 @ params["we2"] + params["be2"]
    return x2, e2


if __name__ == "__main__":
    key = jax.random.PRNGKey(0)
    keys = jax.random.split(key, 12)

    N, F_IN, HIDDEN, HEADS, E_DIM = 16, 8, 16, 4, 8

    x = jax.random.normal(keys[0], (N, F_IN), jnp.float32)

    # Directed graph: ring edges + skip-3 edges (no self-loops, no duplicates).
    src = jnp.concatenate([jnp.arange(N), jnp.arange(N)])
    dst = jnp.concatenate([(jnp.arange(N) + 1) % N, (jnp.arange(N) + 3) % N])
    edge_index = jnp.stack([src, dst]).astype(jnp.int32)           # [2, E]
    E = edge_index.shape[1]
    edge_attr = jax.random.normal(keys[1], (E, E_DIM), jnp.float32)

    # Glue: densify edge_index into an int8 {0,1} adjacency (adj[i, j] = 1 iff
    # edge j -> i) and add self-loops (GATConv's add_self_loops=True default).
    adj = jnp.zeros((N, N), jnp.int8).at[edge_index[1], edge_index[0]].set(1)
    adj = adj.at[jnp.arange(N), jnp.arange(N)].set(1)

    def glorot(k, shape):
        lim = (6.0 / (shape[0] + shape[-1])) ** 0.5
        return jax.random.uniform(k, shape, jnp.float32, -lim, lim)

    params = dict(
        # gat1: in -> hidden, heads=HEADS, concat
        w1=glorot(keys[2], (F_IN, HEADS * HIDDEN)),
        asrc1=glorot(keys[3], (HEADS, HIDDEN)),
        adst1=glorot(keys[4], (HEADS, HIDDEN)),
        b1=jnp.zeros((1, HEADS * HIDDEN), jnp.float32),
        # gat2: hidden*heads -> hidden, heads=1, concat=False
        w2=glorot(keys[5], (HEADS * HIDDEN, HIDDEN)),
        asrc2=glorot(keys[6], (1, HIDDEN)),
        adst2=glorot(keys[7], (1, HIDDEN)),
        b2=jnp.zeros((1, HIDDEN), jnp.float32),
        # edge MLP: Linear(E_DIM, 32) -> ReLU -> Linear(32, HIDDEN)
        we1=glorot(keys[8], (E_DIM, 32)),
        be1=jnp.zeros((1, 32), jnp.float32),
        we2=glorot(keys[9], (32, HIDDEN)),
        be2=jnp.zeros((1, HIDDEN), jnp.float32),
    )

    def run(single_buffer):
        return gat_encoder(x, adj, edge_attr, params, heads=HEADS,
                           hidden=HIDDEN,
                           single_buffer_invariants=single_buffer)

    try:
        x_out, edge_out = run(True)
        jax.block_until_ready((x_out, edge_out))
    except Exception:
        # Compatibility fallback if this jax build rejects pl.Buffered(1)
        # single-buffering of grid-invariant operands.
        x_out, edge_out = run(False)
        jax.block_until_ready((x_out, edge_out))

    assert x_out.shape == (N, HIDDEN) and edge_out.shape == (E, HIDDEN)
    assert bool(jnp.all(jnp.isfinite(x_out))) and bool(jnp.all(jnp.isfinite(edge_out)))

    # Loose sanity check vs. a pure-JAX fp32 reference (bf16 MXU operands,
    # bf16 elementwise on v6e/v7x, approx reciprocal -> exact match not expected).
    x_ref, e_ref = _reference(x, adj, edge_attr, params,
                              heads=HEADS, hidden=HIDDEN)
    assert float(jnp.max(jnp.abs(x_out - x_ref))) < 0.2
    assert float(jnp.max(jnp.abs(edge_out - e_ref))) < 0.2

    print("KERNEL_OK")
</pallas_src>

<mosaic_0001>
module attributes {stable_mosaic.version = 11 : i64} {
  func.func @_proj1_kernel(%arg0: i32, %arg1: memref<16x8xbf16, #tpu.memory_space<vmem>>, %arg2: memref<8x128xbf16, #tpu.memory_space<vmem>>, %arg3: memref<8x128xbf16, #tpu.memory_space<vmem>>, %arg4: memref<16x128xbf16, #tpu.memory_space<vmem>>, %arg5: memref<8x16xf32, #tpu.memory_space<vmem>>) attributes {dimension_semantics = [#tpu.dimension_semantics<parallel>], iteration_bounds = array<i64: 1>, scalar_prefetch = 0 : i64, scratch_operands = 0 : i64, tpu.core_type = #tpu.core_type<tc>, window_params = [{transform_indices = @transform_0, window_bounds = array<i64: 16, 8>}, {pipeline_mode = #tpu.pipeline_mode<synchronous>, transform_indices = @transform_1, window_bounds = array<i64: 8, 128>}, {pipeline_mode = #tpu.pipeline_mode<synchronous>, transform_indices = @transform_2, window_bounds = array<i64: 8, 128>}, {transform_indices = @transform_3, window_bounds = array<i64: 16, 128>}, {transform_indices = @transform_4, window_bounds = array<i64: 8, 16>}]} {
    %c0 = arith.constant 0 : index
    %c0_0 = arith.constant 0 : index
    %0 = vector.load %arg1[%c0, %c0_0] : memref<16x8xbf16, #tpu.memory_space<vmem>>, vector<16x8xbf16>
    %c0_1 = arith.constant 0 : index
    %c0_2 = arith.constant 0 : index
    %1 = vector.load %arg2[%c0_1, %c0_2] : memref<8x128xbf16, #tpu.memory_space<vmem>>, vector<8x128xbf16>
    %cst = arith.constant dense<0.000000e+00> : vector<16x128xf32>
    %2 = tpu.matmul %0, %1, %cst {dimension_numbers = #tpu.dot_dimension_numbers<[1], [0], [0], [1], [0, 0, 1, 1], [], []>} : vector<16x8xbf16>, vector<8x128xbf16>, vector<16x128xf32> -> vector<16x128xf32>
    %3 = arith.truncf %2 : vector<16x128xf32> to vector<16x128xbf16>
    %c0_3 = arith.constant 0 : index
    %c0_4 = arith.constant 0 : index
    %4 = vector.load %arg4[%c0_3, %c0_4] : memref<16x128xbf16, #tpu.memory_space<vmem>>, vector<16x128xbf16>
    tpu.vector_store %arg4[%c0_3, %c0_4], %3 {strides = array<i32>} : memref<16x128xbf16, #tpu.memory_space<vmem>>, vector<16x128xbf16>,
    %c0_5 = arith.constant 0 : index
    %c0_6 = arith.constant 0 : index
    %5 = vector.load %arg3[%c0_5, %c0_6] : memref<8x128xbf16, #tpu.memory_space<vmem>>, vector<8x128xbf16>
    %cst_7 = arith.constant dense<0.000000e+00> : vector<8x16xf32>
    %6 = tpu.matmul %5, %3, %cst_7 {dimension_numbers = #tpu.dot_dimension_numbers<[1], [1], [0], [0], [0, 0, 1, 0], [], []>} : vector<8x128xbf16>, vector<16x128xbf16>, vector<8x16xf32> -> vector<8x16xf32>
    %c0_8 = arith.constant 0 : index
    %c0_9 = arith.constant 0 : index
    %7 = vector.load %arg5[%c0_8, %c0_9] : memref<8x16xf32, #tpu.memory_space<vmem>>, vector<8x16xf32>
    tpu.vector_store %arg5[%c0_8, %c0_9], %6 {strides = array<i32>} : memref<8x16xf32, #tpu.memory_space<vmem>>, vector<8x16xf32>,
    return
  }
  func.func @transform_0(%arg0: i32) -> (i32, i32) {
    %c0_i32 = arith.constant 0 : i32
    %c0_i32_0 = arith.constant 0 : i32
    return %arg0, %c0_i32 : i32, i32
  }
  func.func @transform_1(%arg0: i32) -> (i32, i32) {
    %c0_i32 = arith.constant 0 : i32
    %c0_i32_0 = arith.constant 0 : i32
    %c0_i32_1 = arith.constant 0 : i32
    return %c0_i32, %c0_i32_0 : i32, i32
  }
  func.func @transform_2(%arg0: i32) -> (i32, i32) {
    %c0_i32 = arith.constant 0 : i32
    %c0_i32_0 = arith.constant 0 : i32
    %c0_i32_1 = arith.constant 0 : i32
    return %c0_i32, %c0_i32_0 : i32, i32
  }
  func.func @transform_3(%arg0: i32) -> (i32, i32) {
    %c0_i32 = arith.constant 0 : i32
    %c0_i32_0 = arith.constant 0 : i32
    return %arg0, %c0_i32 : i32, i32
  }
  func.func @transform_4(%arg0: i32) -> (i32, i32) {
    %c0_i32 = arith.constant 0 : i32
    %c0_i32_0 = arith.constant 0 : i32
    return %c0_i32, %arg0 : i32, i32
  }
}

module attributes {stable_mosaic.version = 11 : i64} {
  func.func @_proj1_kernel(%arg0: i32, %arg1: memref<16x8xbf16, #tpu.memory_space<vmem>>, %arg2: memref<8x128xbf16, #tpu.memory_space<vmem>>, %arg3: memref<8x128xbf16, #tpu.memory_space<vmem>>, %arg4: memref<16x128xbf16, #tpu.memory_space<vmem>>, %arg5: memref<8x16xf32, #tpu.memory_space<vmem>>) attributes {dimension_semantics = [#tpu.dimension_semantics<parallel>], iteration_bounds = array<i64: 1>, scalar_prefetch = 0 : i64, scratch_operands = 0 : i64, tpu.core_type = #tpu.core_type<tc>, window_params = [{transform_indices = @transform_0, window_bounds = array<i64: 16, 8>}, {pipeline_mode = #tpu.pipeline_mode<synchronous>, transform_indices = @transform_1, window_bounds = array<i64: 8, 128>}, {pipeline_mode = #tpu.pipeline_mode<synchronous>, transform_indices = @transform_2, window_bounds = array<i64: 8, 128>}, {transform_indices = @transform_3, window_bounds = array<i64: 16, 128>}, {transform_indices = @transform_4, window_bounds = array<i64: 8, 16>}]} {
    %c0 = arith.constant 0 : index
    %c0_0 = arith.constant 0 : index
    %0 = vector.load %arg1[%c0, %c0_0] : memref<16x8xbf16, #tpu.memory_space<vmem>>, vector<16x8xbf16>
    %c0_1 = arith.constant 0 : index
    %c0_2 = arith.constant 0 : index
    %1 = vector.load %arg2[%c0_1, %c0_2] : memref<8x128xbf16, #tpu.memory_space<vmem>>, vector<8x128xbf16>
    %cst = arith.constant dense<0.000000e+00> : vector<16x128xf32>
    %2 = tpu.matmul %0, %1, %cst {dimension_numbers = #tpu.dot_dimension_numbers<[1], [0], [0], [1], [0, 0, 1, 1], [], []>} : vector<16x8xbf16>, vector<8x128xbf16>, vector<16x128xf32> -> vector<16x128xf32>
    %3 = arith.truncf %2 : vector<16x128xf32> to vector<16x128xbf16>
    %c0_3 = arith.constant 0 : index
    %c0_4 = arith.constant 0 : index
    %4 = vector.load %arg4[%c0_3, %c0_4] : memref<16x128xbf16, #tpu.memory_space<vmem>>, vector<16x128xbf16>
    tpu.vector_store %arg4[%c0_3, %c0_4], %3 {strides = array<i32>} : memref<16x128xbf16, #tpu.memory_space<vmem>>, vector<16x128xbf16>,
    %c0_5 = arith.constant 0 : index
    %c0_6 = arith.constant 0 : index
    %5 = vector.load %arg3[%c0_5, %c0_6] : memref<8x128xbf16, #tpu.memory_space<vmem>>, vector<8x128xbf16>
    %cst_7 = arith.constant dense<0.000000e+00> : vector<8x16xf32>
    %6 = tpu.matmul %5, %3, %cst_7 {dimension_numbers = #tpu.dot_dimension_numbers<[1], [1], [0], [0], [0, 0, 1, 0], [], []>} : vector<8x128xbf16>, vector<16x128xbf16>, vector<8x16xf32> -> vector<8x16xf32>
    %c0_8 = arith.constant 0 : index
    %c0_9 = arith.constant 0 : index
    %7 = vector.load %arg5[%c0_8, %c0_9] : memref<8x16xf32, #tpu.memory_space<vmem>>, vector<8x16xf32>
    tpu.vector_store %arg5[%c0_8, %c0_9], %6 {strides = array<i32>} : memref<8x16xf32, #tpu.memory_space<vmem>>, vector<8x16xf32>,
    return
  }
  func.func @transform_0(%arg0: i32) -> (i32, i32) {
    %c0_i32 = arith.constant 0 : i32
    %c0_i32_0 = arith.constant 0 : i32
    return %arg0, %c0_i32 : i32, i32
  }
  func.func @transform_1(%arg0: i32) -> (i32, i32) {
    %c0_i32 = arith.constant 0 : i32
    %c0_i32_0 = arith.constant 0 : i32
    %c0_i32_1 = arith.constant 0 : i32
    return %c0_i32, %c0_i32_0 : i32, i32
  }
  func.func @transform_2(%arg0: i32) -> (i32, i32) {
    %c0_i32 = arith.constant 0 : i32
    %c0_i32_0 = arith.constant 0 : i32
    %c0_i32_1 = arith.constant 0 : i32
    return %c0_i32, %c0_i32_0 : i32, i32
  }
  func.func @transform_3(%arg0: i32) -> (i32, i32) {
    %c0_i32 = arith.constant 0 : i32
    %c0_i32_0 = arith.constant 0 : i32
    return %arg0, %c0_i32 : i32, i32
  }
  func.func @transform_4(%arg0: i32) -> (i32, i32) {
    %c0_i32 = arith.constant 0 : i32
    %c0_i32_0 = arith.constant 0 : i32
    return %c0_i32, %arg0 : i32, i32
  }
}

</mosaic_0001>

<bundles_post_ra>
// kernel: tpu_custom_call.1
= control target key start
LH: loop header
LB: loop body
LE: loop exit
PB: predicated region body
PF: predicated region fallthrough
CT: control target
= control target key end

     0   :  { %10 = vsyncpa [#allocation3], 0  ;;  %vm31_vm0 = vcmask 1043456   ;;  %s220_s0 = inlined_call_operand.vmem [shape: bf16[16,8], index: 0, kind: input, shape index: {}]   ;;  %s221_s1 = inlined_call_operand.vmem [shape: bf16[8,128], index: 1, kind: input, shape index: {}]   ;;  %s222_s2 = inlined_call_operand.vmem [shape: bf16[8,128], index: 2, kind: input, shape index: {}]   ;;  %s223_s3 = inlined_call_operand.hbm [shape: bf16[16,128], index: 3, kind: output, shape index: {0}]   ;;  %s224_s4 = inlined_call_operand.hbm [shape: f32[8,16], index: 4, kind: output, shape index: {1}]  }
   0x1   :  { %v21_v0 = vld [vmem:[%s221_s1] sm:$0xf] }
   0x2   :  { %v33_v1 = vsel %vm31_vm0, %v21_v0, 0  ;;  %v114_v2 = vld [vmem:[%s220_s0] sm:$0xff] }
   0x3   :  { %11 = vsyncpa [#allocation5], 0  ;;  %42 = vmatpush.bf16.msra.mxu0 %v33_v1  ;;  %vm27_vm1 = vcmask 64512   ;;  %v53_v11 = vld [vmem:[%s222_s2] sm:$0xf]  ;;  %s176_s0 = smov [#allocation2]  }
   0x4   :  { %s79_s20 = sshll.u32 %s176_s0, 4  ;;  %s81_s23 = sshll.u32 %s223_s3, 4  ;;  %vm73_vm2 = vcmask 130048   ;;  %s80_s20 = int_to_ptr.vmem [resolvable:$true] %s79_s20  ;;  %s82_s23 = int_to_ptr.hbm [resolvable:$true] %s81_s23 }
   0x5   :  { %s177_s24 = smov 64   ;;  %s178_s25 = smov 4  }
   0x6   :  { %113 = vmatmul.msk.bf16.vlgmr.msra.gmra.mxu0 %vm27_vm1, %v114_v2  ;;  %s179_s26 = smov [#allocation4]   ;;  %s95_s30 = sshll.u32 %s224_s4, 4  ;;  %s96_s30 = int_to_ptr.hbm [resolvable:$true] %s95_s30 }
   0x7   :  { %s93_s27 = sshll.u32 %s179_s26, 4  ;;  %s94_s27 = int_to_ptr.vmem [resolvable:$true] %s93_s27 }
  0x83   :  { %v44_v3 = vpop.f32.mrf.mxu0 }
  0x84   :  { %v49_v4 = vpack.c.bf16 %v44_v3, %v44_v3 }
  0x86   :  { %v56_v9 = vunpack.c.l.b16 %v49_v4 }
  0x8b   :  { %v46_v5 = vpop.f32.mrf.mxu0 }
  0x8c   :  { %v50_v6 = vpack.c.bf16 %v46_v5, %v46_v5  ;;  %v118_v7 = vpack.c.bf16 %v46_v5, %v44_v3 }
  0x8e   :  { %119 = vst [vmem:[#allocation2] sm:$0xff] %v118_v7   ;;  %v57_v8 = vunpack.c.l.b16 %v50_v6 }
  0x8f   :  { %87 = dma.vmem_to_hbm [thread:$0]  %s80_s20, 128, %s82_s23, [#allocation3], %s177_s24, %s177_s24, %s178_s25  }
  0x90   :  { %v58_v10 = vpack.c.b16 %v57_v8, %v56_v9 }
  0x92   :  { %67 = vmatpush.bf16.xpose.msra.mxu1 %v58_v10 }
  0x99   :  { %68 = vmatmul.bf16.vlgmr.msra.gmra.mxu1 %v53_v11 }
 0x116   :  { %v69_v12 = vpop.f32.mrf.mxu1 }
 0x117   :  { %74 = vst.msk [vmem:[#allocation4] sm:$0xff] %vm73_vm2, %v69_v12 }
 0x118   :  { %98 = dma.vmem_to_hbm [thread:$0]  %s94_s27, 128, %s96_s30, [#allocation5]  }
 0x11e   :  { %v71_v13 = vpop.f32.mrf.mxu1 }
 0x11f   :  { %172 = dma.done.wait [#allocation3], 128  }
 0x120   :  { %173 = vsyncadd [#allocation3], 4294967168 }
 0x121   :  { %174 = dma.done.wait [#allocation5], 128  }
 0x122   :  { %175 = vsyncadd [#allocation5], 4294967168 }
 0x123   :  { %107 = vsyncpa [#allocation3], 1 }
 0x124   :  { %108 = vsyncpa [#allocation5], 1 }

// kernel: tpu_custom_call.1
= control target key start
LH: loop header
LB: loop body
LE: loop exit
PB: predicated region body
PF: predicated region fallthrough
CT: control target
= control target key end

     0   :  { %10 = vsyncpa [#allocation3], 0  ;;  %vm31_vm0 = vcmask 1043456   ;;  %s220_s0 = inlined_call_operand.vmem [shape: bf16[16,8], index: 0, kind: input, shape index: {}]   ;;  %s221_s1 = inlined_call_operand.vmem [shape: bf16[8,128], index: 1, kind: input, shape index: {}]   ;;  %s222_s2 = inlined_call_operand.vmem [shape: bf16[8,128], index: 2, kind: input, shape index: {}]   ;;  %s223_s3 = inlined_call_operand.hbm [shape: bf16[16,128], index: 3, kind: output, shape index: {0}]   ;;  %s224_s4 = inlined_call_operand.hbm [shape: f32[8,16], index: 4, kind: output, shape index: {1}]  }
   0x1   :  { %v21_v0 = vld [vmem:[%s221_s1] sm:$0xf] }
   0x2   :  { %v33_v1 = vsel %vm31_vm0, %v21_v0, 0  ;;  %v114_v2 = vld [vmem:[%s220_s0] sm:$0xff] }
   0x3   :  { %11 = vsyncpa [#allocation5], 0  ;;  %42 = vmatpush.bf16.msra.mxu0 %v33_v1  ;;  %vm27_vm1 = vcmask 64512   ;;  %v53_v11 = vld [vmem:[%s222_s2] sm:$0xf]  ;;  %s176_s0 = smov [#allocation2]  }
   0x4   :  { %s79_s20 = sshll.u32 %s176_s0, 4  ;;  %s81_s23 = sshll.u32 %s223_s3, 4  ;;  %vm73_vm2 = vcmask 130048   ;;  %s80_s20 = int_to_ptr.vmem [resolvable:$true] %s79_s20  ;;  %s82_s23 = int_to_ptr.hbm [resolvable:$true] %s81_s23 }
   0x5   :  { %s177_s24 = smov 64   ;;  %s178_s25 = smov 4  }
   0x6   :  { %113 = vmatmul.msk.bf16.vlgmr.msra.gmra.mxu0 %vm27_vm1, %v114_v2  ;;  %s179_s26 = smov [#allocation4]   ;;  %s95_s30 = sshll.u32 %s224_s4, 4  ;;  %s96_s30 = int_to_ptr.hbm [resolvable:$true] %s95_s30 }
   0x7   :  { %s93_s27 = sshll.u32 %s179_s26, 4  ;;  %s94_s27 = int_to_ptr.vmem [resolvable:$true] %s93_s27 }
  0x83   :  { %v44_v3 = vpop.f32.mrf.mxu0 }
  0x84   :  { %v49_v4 = vpack.c.bf16 %v44_v3, %v44_v3 }
  0x86   :  { %v56_v9 = vunpack.c.l.b16 %v49_v4 }
  0x8b   :  { %v46_v5 = vpop.f32.mrf.mxu0 }
  0x8c   :  { %v50_v6 = vpack.c.bf16 %v46_v5, %v46_v5  ;;  %v118_v7 = vpack.c.bf16 %v46_v5, %v44_v3 }
  0x8e   :  { %119 = vst [vmem:[#allocation2] sm:$0xff] %v118_v7   ;;  %v57_v8 = vunpack.c.l.b16 %v50_v6 }
  0x8f   :  { %87 = dma.vmem_to_hbm [thread:$0]  %s80_s20, 128, %s82_s23, [#allocation3], %s177_s24, %s177_s24, %s178_s25  }
  0x90   :  { %v58_v10 = vpack.c.b16 %v57_v8, %v56_v9 }
  0x92   :  { %67 = vmatpush.bf16.xpose.msra.mxu1 %v58_v10 }
  0x99   :  { %68 = vmatmul.bf16.vlgmr.msra.gmra.mxu1 %v53_v11 }
 0x116   :  { %v69_v12 = vpop.f32.mrf.mxu1 }
 0x117   :  { %74 = vst.msk [vmem:[#allocation4] sm:$0xff] %vm73_vm2, %v69_v12 }
 0x118   :  { %98 = dma.vmem_to_hbm [thread:$0]  %s94_s27, 128, %s96_s30, [#allocation5]  }
 0x11e   :  { %v71_v13 = vpop.f32.mrf.mxu1 }
 0x11f   :  { %172 = dma.done.wait [#allocation3], 128  }
 0x120   :  { %173 = vsyncadd [#allocation3], 4294967168 }
 0x121   :  { %174 = dma.done.wait [#allocation5], 128  }
 0x122   :  { %175 = vsyncadd [#allocation5], 4294967168 }
 0x123   :  { %107 = vsyncpa [#allocation3], 1 }
 0x124   :  { %108 = vsyncpa [#allocation5], 1 }

</bundles_post_ra>
